<compile_context>
chip_gen: v6e
topology: v6e:2x2x1
jax: 0.10.0
libtpu: 0.0.40
codegen_flags: <defaults>
</compile_context>

<pallas_src>
import jax
import jax.numpy as jnp
from jax import lax
from jax.experimental import pallas as pl
from jax.experimental.pallas import tpu as pltpu


def _get_divisible_by(val, divisor):
    # mobile_cv hp.get_divisible_by
    ret = int(val + divisor / 2) // divisor * divisor
    return max(ret, divisor)


def _pick_hw_chunk(hw, max_chunk=2048):
    """Largest chunk <= max_chunk that divides HW, preferring multiples of 128."""
    if hw <= max_chunk:
        return hw
    best_any = None
    for c in range(max_chunk, 0, -1):
        if hw % c == 0:
            if c % 128 == 0:
                return c
            if best_any is None:
                best_any = c
    return best_any if best_any is not None else hw


def _make_irpool_kernel(nb, cin, cmid, cout, hw, hw_chunk):
    n_chunks = hw // hw_chunk

    def kernel(x_ref, w_pw_ref, scale_ref, shift_ref, w_pwl_ref, b_pwl_ref, o_ref):
        # x_ref : (nb, Cin, HW)   storage dtype (bf16 in the demo)
        # w_pw  : (Cmid, Cin)     storage dtype        (pw conv weight, transposed)
        # scale : (Cmid, 1) f32   folded conv-bias + eval-BN affine
        # shift : (Cmid, 1) f32
        # w_pwl : (Cout, Cmid) f32  (pwl weight, transposed, 1/HW folded in)
        # b_pwl : (Cout, 1) f32
        # o_ref : (nb, Cout, HW)  (Cout == Cin, residual path active)
        w_pw = w_pw_ref[...]
        scale = scale_ref[...]
        shift = shift_ref[...]
        w_pwl = w_pwl_ref[...]
        b_pwl = b_pwl_ref[...]
        # Ones column for the MXU-based spatial sum (hoisted out of all loops).
        ones_col = jnp.ones((hw_chunk, 1), jnp.float32)

        for b in range(nb):  # nb is small; static unroll over batch elements
            def chunk_sum(j, pooled):
                start = pl.multiple_of(j * hw_chunk, hw_chunk)
                xc = x_ref[b, :, pl.ds(start, hw_chunk)]            # (Cin, CH)
                # pw: 1x1 conv == matmul on the MXU, f32 accumulate.
                y = jnp.dot(w_pw, xc, preferred_element_type=jnp.float32)  # (Cmid, CH)
                y = jnp.maximum(y * scale + shift, 0.0)
                # Spatial sum on the MXU (frees VPU/XLU slots).
                return pooled + jnp.dot(y, ones_col,
                                        preferred_element_type=jnp.float32)

            init = jnp.zeros((cmid, 1), jnp.float32)
            if n_chunks == 1:
                pooled = chunk_sum(0, init)
            else:
                pooled = lax.fori_loop(0, n_chunks, chunk_sum, init,
                                       unroll=(n_chunks <= 8))

            # pwl: 1x1 conv on the pooled vector + bias + ReLU (no BN).
            # The 1/HW mean factor is already folded into w_pwl.
            z = jnp.dot(w_pwl, pooled, preferred_element_type=jnp.float32) + b_pwl
            z = jnp.maximum(z, 0.0)                                   # (Cout, 1)

            # res_conn ('default', Cin==Cout, stride==1): broadcast add over HW.
            o_ref[b] = (x_ref[b].astype(jnp.float32) + z).astype(o_ref.dtype)

    return kernel


def irpool_block(x_nchw, params, *, block_n=None, hw_chunk_max=2048):
    """x_nchw: (N, Cin, H, W). Returns (N, Cout, H, W) in x's dtype."""
    N, Cin, H, W = x_nchw.shape
    HW = H * W
    w_pwT, pw_scale, pw_shift, w_pwlT, b_pwl = params
    Cmid = w_pwT.shape[0]
    Cout = w_pwlT.shape[0]
    # Residual 'default' path is only valid under these defaults.
    assert Cin == Cout, "IRPoolBlock residual path requires in_channels == out_channels"
    assert w_pwT.shape == (Cmid, Cin) and w_pwlT.shape == (Cout, Cmid)

    # NCHW -> (N, C, HW): pure reshape, no transpose / extra HBM pass.
    x_flat = x_nchw.reshape(N, Cin, HW)

    # Fold the 1/HW (AdaptiveAvgPool mean) factor into the pwl weight.
    w_pwl_eff = w_pwlT.astype(jnp.float32) / float(HW)

    # Pick how many batch elements to block per grid step (amortize ~0.35us/step).
    if block_n is None:
        per_batch_bytes = (Cin + Cout) * HW * x_flat.dtype.itemsize
        target = 256 * 1024
        block_n = 1
        for nb in range(1, N + 1):
            if N % nb == 0 and nb * per_batch_bytes <= target:
                block_n = nb
    assert N % block_n == 0
    grid_n = N // block_n

    hw_chunk = _pick_hw_chunk(HW, hw_chunk_max)
    kernel = _make_irpool_kernel(block_n, Cin, Cmid, Cout, HW, hw_chunk)

    # VMEM budget: double-buffered in/out blocks + (once-DMA'd) weights + margin,
    # clamped to stay inside v5e's scoped limit headroom and v7x's 64 MiB VMEM.
    dsize = x_flat.dtype.itemsize
    blk_bytes = block_n * (Cin + Cout) * HW * dsize
    w_bytes = (w_pwT.size * w_pwT.dtype.itemsize + w_pwl_eff.size * 4
               + pw_scale.size * 4 + pw_shift.size * 4 + b_pwl.size * 4)
    vmem_limit = int(min(max(2 * (blk_bytes + 2 * w_bytes) + (2 << 20), 32 << 20),
                         56 << 20))

    out_flat = pl.pallas_call(
        kernel,
        out_shape=jax.ShapeDtypeStruct((N, Cout, HW), x_flat.dtype),
        grid_spec=pltpu.PrefetchScalarGridSpec(
            num_scalar_prefetch=0,
            grid=(grid_n,),
            in_specs=[
                pl.BlockSpec((block_n, Cin, HW), lambda b: (b, 0, 0)),
                pl.BlockSpec((Cmid, Cin), lambda b: (0, 0)),
                pl.BlockSpec((Cmid, 1), lambda b: (0, 0)),
                pl.BlockSpec((Cmid, 1), lambda b: (0, 0)),
                pl.BlockSpec((Cout, Cmid), lambda b: (0, 0)),
                pl.BlockSpec((Cout, 1), lambda b: (0, 0)),
            ],
            out_specs=pl.BlockSpec((block_n, Cout, HW), lambda b: (b, 0, 0)),
        ),
        compiler_params=pltpu.CompilerParams(
            dimension_semantics=("parallel",),
            vmem_limit_bytes=vmem_limit),
    )(x_flat, w_pwT, pw_scale, pw_shift, w_pwl_eff, b_pwl)

    return out_flat.reshape(N, Cout, H, W)


def init_params(key, in_channels, out_channels, expansion=6, width_divisor=8,
                weight_dtype=jnp.bfloat16):
    Cmid = _get_divisible_by(in_channels * expansion, width_divisor)
    ks = jax.random.split(key, 8)
    # pw conv (1x1): torch weight (Cmid, Cin, 1, 1) -> stored transposed (Cmid, Cin)
    w_pw = 0.1 * jax.random.normal(ks[0], (Cmid, in_channels), jnp.float32)
    b_pw = 0.1 * jax.random.normal(ks[1], (Cmid,), jnp.float32)
    # eval-mode BN params
    gamma = 1.0 + 0.1 * jax.random.normal(ks[2], (Cmid,), jnp.float32)
    beta = 0.1 * jax.random.normal(ks[3], (Cmid,), jnp.float32)
    running_mean = 0.1 * jax.random.normal(ks[4], (Cmid,), jnp.float32)
    running_var = 1.0 + 0.1 * jax.random.uniform(ks[5], (Cmid,), jnp.float32)
    eps = 1e-5
    # Fold conv bias + eval BN into a single post-matmul affine (exact; does not
    # depend on the weight quantization).
    pw_scale = gamma / jnp.sqrt(running_var + eps)
    pw_shift = (b_pw - running_mean) * pw_scale + beta
    # pwl conv (1x1): stored transposed (Cout, Cmid) + bias, no BN
    w_pwl = 0.1 * jax.random.normal(ks[6], (out_channels, Cmid), jnp.float32)
    b_pwl = 0.1 * jax.random.normal(ks[7], (out_channels,), jnp.float32)
    return (w_pw.astype(weight_dtype),            # (Cmid, Cin)  bf16 storage
            pw_scale.reshape(Cmid, 1),            # (Cmid, 1)    f32
            pw_shift.reshape(Cmid, 1),            # (Cmid, 1)    f32
            w_pwl,                                # (Cout, Cmid) f32
            b_pwl.reshape(out_channels, 1))       # (Cout, 1)    f32


def irpool_reference(x_nchw, params):
    """Pure-JAX f32 reference of the same forward (same quantized params)."""
    w_pwT, pw_scale, pw_shift, w_pwlT, b_pwl = params
    N, Cin, H, W = x_nchw.shape
    x = x_nchw.reshape(N, Cin, H * W).astype(jnp.float32)
    y = jnp.einsum('mc,ncs->nms', w_pwT.astype(jnp.float32), x)
    y = jnp.maximum(y * pw_scale[None] + pw_shift[None], 0.0)
    pooled = jnp.mean(y, axis=-1, keepdims=True)                      # (N, Cmid, 1)
    z = jnp.einsum('om,nms->nos', w_pwlT.astype(jnp.float32), pooled) + b_pwl[None]
    z = jnp.maximum(z, 0.0)                                           # (N, Cout, 1)
    out = x + z
    return out.reshape(N, -1, H, W)


if __name__ == "__main__":
    key = jax.random.PRNGKey(0)
    k_x, k_p = jax.random.split(key)

    # in_channels == out_channels and stride == 1 -> residual add is active
    N, C, H, W = 2, 4, 16, 16
    x = jax.random.normal(k_x, (N, C, H, W), jnp.float32).astype(jnp.bfloat16)
    params = init_params(k_p, in_channels=C, out_channels=C)

    out = irpool_block(x, params)
    out = jax.block_until_ready(out)

    ref = irpool_reference(x, params)
    assert out.shape == (N, C, H, W)
    assert out.dtype == x.dtype
    # Output is stored in bf16 -> allow bf16 rounding tolerance vs the f32 reference.
    assert jnp.allclose(out.astype(jnp.float32), ref, atol=3e-2, rtol=3e-2), (
        "mismatch vs reference, max abs err = "
        f"{float(jnp.max(jnp.abs(out.astype(jnp.float32) - ref)))}")

    print("KERNEL_OK")
</pallas_src>

<mosaic_0001>
module attributes {stable_mosaic.version = 11 : i64} {
  func.func @kernel(%arg0: i32, %arg1: memref<2x4x256xbf16, #tpu.memory_space<vmem>>, %arg2: memref<24x4xbf16, #tpu.memory_space<vmem>>, %arg3: memref<24x1xf32, #tpu.memory_space<vmem>>, %arg4: memref<24x1xf32, #tpu.memory_space<vmem>>, %arg5: memref<4x24xf32, #tpu.memory_space<vmem>>, %arg6: memref<4x1xf32, #tpu.memory_space<vmem>>, %arg7: memref<2x4x256xbf16, #tpu.memory_space<vmem>>) attributes {dimension_semantics = [#tpu.dimension_semantics<parallel>], iteration_bounds = array<i64: 1>, scalar_prefetch = 0 : i64, scratch_operands = 0 : i64, tpu.core_type = #tpu.core_type<tc>, window_params = [{transform_indices = @transform_0, window_bounds = array<i64: 2, 4, 256>}, {pipeline_mode = #tpu.pipeline_mode<synchronous>, transform_indices = @transform_1, window_bounds = array<i64: 24, 4>}, {pipeline_mode = #tpu.pipeline_mode<synchronous>, transform_indices = @transform_2, window_bounds = array<i64: 24, 1>}, {pipeline_mode = #tpu.pipeline_mode<synchronous>, transform_indices = @transform_3, window_bounds = array<i64: 24, 1>}, {pipeline_mode = #tpu.pipeline_mode<synchronous>, transform_indices = @transform_4, window_bounds = array<i64: 4, 24>}, {pipeline_mode = #tpu.pipeline_mode<synchronous>, transform_indices = @transform_5, window_bounds = array<i64: 4, 1>}, {transform_indices = @transform_6, window_bounds = array<i64: 2, 4, 256>}]} {
    %c0 = arith.constant 0 : index
    %c0_0 = arith.constant 0 : index
    %0 = vector.load %arg2[%c0, %c0_0] : memref<24x4xbf16, #tpu.memory_space<vmem>>, vector<24x4xbf16>
    %c0_1 = arith.constant 0 : index
    %c0_2 = arith.constant 0 : index
    %1 = vector.load %arg3[%c0_1, %c0_2] : memref<24x1xf32, #tpu.memory_space<vmem>>, vector<24x1xf32>
    %c0_3 = arith.constant 0 : index
    %c0_4 = arith.constant 0 : index
    %2 = vector.load %arg4[%c0_3, %c0_4] : memref<24x1xf32, #tpu.memory_space<vmem>>, vector<24x1xf32>
    %c0_5 = arith.constant 0 : index
    %c0_6 = arith.constant 0 : index
    %3 = vector.load %arg5[%c0_5, %c0_6] : memref<4x24xf32, #tpu.memory_space<vmem>>, vector<4x24xf32>
    %c0_7 = arith.constant 0 : index
    %c0_8 = arith.constant 0 : index
    %4 = vector.load %arg6[%c0_7, %c0_8] : memref<4x1xf32, #tpu.memory_space<vmem>>, vector<4x1xf32>
    %cst = arith.constant 1.000000e+00 : f32
    %5 = vector.broadcast %cst : f32 to vector<256x1xf32>
    %cst_9 = arith.constant 0.000000e+00 : f32
    %6 = vector.broadcast %cst_9 : f32 to vector<24x1xf32>
    %c0_i32 = arith.constant 0 : i32
    %7 = tpu.assume_multiple %c0_i32, 256 : i32
    %c0_10 = arith.constant 0 : index
    %c0_11 = arith.constant 0 : index
    %8 = arith.index_cast %7 : i32 to index
    %9 = vector.load %arg1[%c0_10, %c0_11, %8] : memref<2x4x256xbf16, #tpu.memory_space<vmem>>, vector<1x4x256xbf16>
    %10 = vector.shape_cast %9 : vector<1x4x256xbf16> to vector<4x256xbf16>
    %cst_12 = arith.constant dense<0.000000e+00> : vector<24x256xf32>
    %11 = tpu.matmul %0, %10, %cst_12 {dimension_numbers = #tpu.dot_dimension_numbers<[1], [0], [0], [1], [0, 0, 1, 1], [], []>} : vector<24x4xbf16>, vector<4x256xbf16>, vector<24x256xf32> -> vector<24x256xf32>
    %12 = vector.broadcast %1 : vector<24x1xf32> to vector<24x256xf32>
    %13 = arith.mulf %11, %12 : vector<24x256xf32>
    %14 = vector.broadcast %2 : vector<24x1xf32> to vector<24x256xf32>
    %15 = arith.addf %13, %14 : vector<24x256xf32>
    %cst_13 = arith.constant 0.000000e+00 : f32
    %16 = vector.broadcast %cst_13 : f32 to vector<24x256xf32>
    %17 = arith.maximumf %15, %16 : vector<24x256xf32>
    %cst_14 = arith.constant dense<0.000000e+00> : vector<24x1xf32>
    %18 = tpu.matmul %17, %5, %cst_14 {dimension_numbers = #tpu.dot_dimension_numbers<[1], [0], [0], [1], [0, 0, 1, 1], [], []>} : vector<24x256xf32>, vector<256x1xf32>, vector<24x1xf32> -> vector<24x1xf32>
    %19 = arith.addf %6, %18 : vector<24x1xf32>
    %cst_15 = arith.constant dense<0.000000e+00> : vector<4x1xf32>
    %20 = tpu.matmul %3, %19, %cst_15 {dimension_numbers = #tpu.dot_dimension_numbers<[1], [0], [0], [1], [0, 0, 1, 1], [], []>} : vector<4x24xf32>, vector<24x1xf32>, vector<4x1xf32> -> vector<4x1xf32>
    %21 = arith.addf %20, %4 : vector<4x1xf32>
    %cst_16 = arith.constant 0.000000e+00 : f32
    %22 = vector.broadcast %cst_16 : f32 to vector<4x1xf32>
    %23 = arith.maximumf %21, %22 : vector<4x1xf32>
    %c0_17 = arith.constant 0 : index
    %c0_18 = arith.constant 0 : index
    %c0_19 = arith.constant 0 : index
    %24 = vector.load %arg1[%c0_17, %c0_18, %c0_19] : memref<2x4x256xbf16, #tpu.memory_space<vmem>>, vector<1x4x256xbf16>
    %25 = vector.shape_cast %24 : vector<1x4x256xbf16> to vector<4x256xbf16>
    %26 = arith.extf %25 : vector<4x256xbf16> to vector<4x256xf32>
    %27 = vector.broadcast %23 : vector<4x1xf32> to vector<4x256xf32>
    %28 = arith.addf %26, %27 : vector<4x256xf32>
    %29 = arith.truncf %28 : vector<4x256xf32> to vector<4x256xbf16>
    %c0_20 = arith.constant 0 : index
    %c0_21 = arith.constant 0 : index
    %c0_22 = arith.constant 0 : index
    %30 = vector.load %arg7[%c0_20, %c0_21, %c0_22] : memref<2x4x256xbf16, #tpu.memory_space<vmem>>, vector<1x4x256xbf16>
    %31 = vector.shape_cast %30 : vector<1x4x256xbf16> to vector<4x256xbf16>
    %32 = vector.shape_cast %29 : vector<4x256xbf16> to vector<1x4x256xbf16>
    tpu.vector_store %arg7[%c0_20, %c0_21, %c0_22], %32 {strides = array<i32>} : memref<2x4x256xbf16, #tpu.memory_space<vmem>>, vector<1x4x256xbf16>,
    %cst_23 = arith.constant 0.000000e+00 : f32
    %33 = vector.broadcast %cst_23 : f32 to vector<24x1xf32>
    %c0_i32_24 = arith.constant 0 : i32
    %34 = tpu.assume_multiple %c0_i32_24, 256 : i32
    %c1 = arith.constant 1 : index
    %c0_25 = arith.constant 0 : index
    %35 = arith.index_cast %34 : i32 to index
    %36 = vector.load %arg1[%c1, %c0_25, %35] : memref<2x4x256xbf16, #tpu.memory_space<vmem>>, vector<1x4x256xbf16>
    %37 = vector.shape_cast %36 : vector<1x4x256xbf16> to vector<4x256xbf16>
    %cst_26 = arith.constant dense<0.000000e+00> : vector<24x256xf32>
    %38 = tpu.matmul %0, %37, %cst_26 {dimension_numbers = #tpu.dot_dimension_numbers<[1], [0], [0], [1], [0, 0, 1, 1], [], []>} : vector<24x4xbf16>, vector<4x256xbf16>, vector<24x256xf32> -> vector<24x256xf32>
    %39 = vector.broadcast %1 : vector<24x1xf32> to vector<24x256xf32>
    %40 = arith.mulf %38, %39 : vector<24x256xf32>
    %41 = vector.broadcast %2 : vector<24x1xf32> to vector<24x256xf32>
    %42 = arith.addf %40, %41 : vector<24x256xf32>
    %cst_27 = arith.constant 0.000000e+00 : f32
    %43 = vector.broadcast %cst_27 : f32 to vector<24x256xf32>
    %44 = arith.maximumf %42, %43 : vector<24x256xf32>
    %cst_28 = arith.constant dense<0.000000e+00> : vector<24x1xf32>
    %45 = tpu.matmul %44, %5, %cst_28 {dimension_numbers = #tpu.dot_dimension_numbers<[1], [0], [0], [1], [0, 0, 1, 1], [], []>} : vector<24x256xf32>, vector<256x1xf32>, vector<24x1xf32> -> vector<24x1xf32>
    %46 = arith.addf %33, %45 : vector<24x1xf32>
    %cst_29 = arith.constant dense<0.000000e+00> : vector<4x1xf32>
    %47 = tpu.matmul %3, %46, %cst_29 {dimension_numbers = #tpu.dot_dimension_numbers<[1], [0], [0], [1], [0, 0, 1, 1], [], []>} : vector<4x24xf32>, vector<24x1xf32>, vector<4x1xf32> -> vector<4x1xf32>
    %48 = arith.addf %47, %4 : vector<4x1xf32>
    %cst_30 = arith.constant 0.000000e+00 : f32
    %49 = vector.broadcast %cst_30 : f32 to vector<4x1xf32>
    %50 = arith.maximumf %48, %49 : vector<4x1xf32>
    %c1_31 = arith.constant 1 : index
    %c0_32 = arith.constant 0 : index
    %c0_33 = arith.constant 0 : index
    %51 = vector.load %arg1[%c1_31, %c0_32, %c0_33] : memref<2x4x256xbf16, #tpu.memory_space<vmem>>, vector<1x4x256xbf16>
    %52 = vector.shape_cast %51 : vector<1x4x256xbf16> to vector<4x256xbf16>
    %53 = arith.extf %52 : vector<4x256xbf16> to vector<4x256xf32>
    %54 = vector.broadcast %50 : vector<4x1xf32> to vector<4x256xf32>
    %55 = arith.addf %53, %54 : vector<4x256xf32>
    %56 = arith.truncf %55 : vector<4x256xf32> to vector<4x256xbf16>
    %c1_34 = arith.constant 1 : index
    %c0_35 = arith.constant 0 : index
    %c0_36 = arith.constant 0 : index
    %57 = vector.load %arg7[%c1_34, %c0_35, %c0_36] : memref<2x4x256xbf16, #tpu.memory_space<vmem>>, vector<1x4x256xbf16>
    %58 = vector.shape_cast %57 : vector<1x4x256xbf16> to vector<4x256xbf16>
    %59 = vector.shape_cast %56 : vector<4x256xbf16> to vector<1x4x256xbf16>
    tpu.vector_store %arg7[%c1_34, %c0_35, %c0_36], %59 {strides = array<i32>} : memref<2x4x256xbf16, #tpu.memory_space<vmem>>, vector<1x4x256xbf16>,
    return
  }
  func.func @transform_0(%arg0: i32) -> (i32, i32, i32) {
    %c0_i32 = arith.constant 0 : i32
    %c0_i32_0 = arith.constant 0 : i32
    %c0_i32_1 = arith.constant 0 : i32
    return %arg0, %c0_i32, %c0_i32_0 : i32, i32, i32
  }
  func.func @transform_1(%arg0: i32) -> (i32, i32) {
    %c0_i32 = arith.constant 0 : i32
    %c0_i32_0 = arith.constant 0 : i32
    %c0_i32_1 = arith.constant 0 : i32
    return %c0_i32, %c0_i32_0 : i32, i32
  }
  func.func @transform_2(%arg0: i32) -> (i32, i32) {
    %c0_i32 = arith.constant 0 : i32
    %c0_i32_0 = arith.constant 0 : i32
    %c0_i32_1 = arith.constant 0 : i32
    return %c0_i32, %c0_i32_0 : i32, i32
  }
  func.func @transform_3(%arg0: i32) -> (i32, i32) {
    %c0_i32 = arith.constant 0 : i32
    %c0_i32_0 = arith.constant 0 : i32
    %c0_i32_1 = arith.constant 0 : i32
    return %c0_i32, %c0_i32_0 : i32, i32
  }
  func.func @transform_4(%arg0: i32) -> (i32, i32) {
    %c0_i32 = arith.constant 0 : i32
    %c0_i32_0 = arith.constant 0 : i32
    %c0_i32_1 = arith.constant 0 : i32
    return %c0_i32, %c0_i32_0 : i32, i32
  }
  func.func @transform_5(%arg0: i32) -> (i32, i32) {
    %c0_i32 = arith.constant 0 : i32
    %c0_i32_0 = arith.constant 0 : i32
    %c0_i32_1 = arith.constant 0 : i32
    return %c0_i32, %c0_i32_0 : i32, i32
  }
  func.func @transform_6(%arg0: i32) -> (i32, i32, i32) {
    %c0_i32 = arith.constant 0 : i32
    %c0_i32_0 = arith.constant 0 : i32
    %c0_i32_1 = arith.constant 0 : i32
    return %arg0, %c0_i32, %c0_i32_0 : i32, i32, i32
  }
}

</mosaic_0001>

<bundles_post_ra>
// kernel: tpu_custom_call.1
= control target key start
LH: loop header
LB: loop body
LE: loop exit
PB: predicated region body
PF: predicated region fallthrough
CT: control target
= control target key end

     0   :  { %vm61_vm0 = vcmask 1041408   ;;  %v804_v3 = vmov 0   ;;  %vm54_vm1 = vcmask 31744   ;;  %s1029_s0 = inlined_call_operand.vmem [shape: bf16[2,4,256], index: 0, kind: input, shape index: {}]   ;;  %s1030_s1 = inlined_call_operand.vmem [shape: bf16[24,4], index: 1, kind: input, shape index: {}]   ;;  %s1031_s2 = inlined_call_operand.vmem [shape: f32[24,1], index: 2, kind: input, shape index: {}]   ;;  %s1032_s3 = inlined_call_operand.vmem [shape: f32[24,1], index: 3, kind: input, shape index: {}]   ;;  %s1033_s4 = inlined_call_operand.vmem [shape: f32[4,24], index: 4, kind: input, shape index: {}]   ;;  %s1034_s5 = inlined_call_operand.vmem [shape: f32[4,1], index: 5, kind: input, shape index: {}]   ;;  %s1035_s6 = inlined_call_operand.hbm [shape: bf16[2,4,256], index: 6, kind: output, shape index: {}]  }
   0x1   :  { %v646_v0 = vld.sshfl [vmem:[%s1029_s0] sm:$0x33 pattern:$0x76325410]  ;;  %100 = vmatprep.mubr.bf16.mxu1 %v804_v3  ;;  %778 = vset.pattern.permute.xlu0 %v804_v3  ;;  %v29_v6 = vld [vmem:[%s1031_s2 + $0x8] sm:$0xff] }
   0x2   :  { %v53_v1 = vcombine.high %v646_v0, %v646_v0  ;;  %v63_v2 = vsel %vm61_vm0, %v646_v0, 0  ;;  %v28_v4 = vld [vmem:[%s1031_s2] sm:$0xff]  ;;  %779 = vset.pattern.permute.xlu1 %v804_v3 }
   0x3   :  { %v861_v5 = vld [vmem:[%s1030_s1] sm:$0xff]   ;;  %121 = vperm.xlu0 %778, %v28_v4   ;;  %126 = vperm.xlu1 %779, %v29_v6  }
   0x4   :  { %647 = vmatprep.subr.msk.bf16.mxu1 %vm61_vm0, %v53_v1  ;;  %v31_v7 = vld [vmem:[%s1032_s3] sm:$0xff] }
   0x5   :  { %83 = vmatpush1.bf16.msra.mxu1 %v63_v2 }
   0x6   :  { %11 = vsyncpa [#allocation3], 0  ;;  %v32_v8 = vld [vmem:[%s1032_s3 + $0x8] sm:$0xff]  ;;  %v805_v9 = vmov 1.0   ;;  %v30_v10 = vld [vmem:[%s1031_s2 + $0x10] sm:$0xff]  ;;  %v806_v45 = vmov 0.0  }
   0x7   :  { %662 = vmatprep.subr.mxu1 %v805_v9  ;;  %142 = vperm.xlu0 %778, %v31_v7   ;;  %v33_v11 = vld [vmem:[%s1032_s3 + $0x10] sm:$0xff]  ;;  %v887_v12 = vld [vmem:[%s1030_s1 + $0x8] ss:$0 sps:$4 sm:$0xff]   ;;  %vm807_vm2 = vmmov 0   ;;  %v955_v57 = vld [vmem:[%s1033_s4] sm:$0xf] }
   0x8   :  { %648 = vmatmul.mubr.msk.bf16.vlgmr.msra.gmra.mxu1 %vm54_vm1, %v861_v5  ;;  %147 = vperm.xlu1 %779, %v32_v8   ;;  %v654_v53 = vld.sshfl [vmem:[%s1029_s0 + $0x4] sm:$0x33 pattern:$0x76325410]  ;;  %vm247_vm3 = vcmask 195584  }
   0x9   :  { %110 = vmatprep.mubr.bf16.mxu1 %v804_v3  ;;  %663 = vmatpush3.msra.mxu1 %v805_v9  ;;  %v366_v55 = vcombine.high %v654_v53, %v654_v53  ;;  %v368_v58 = vsel %vm61_vm0, %v654_v53, 0  ;;  %v1003_v59 = vld [vmem:[%s1034_s5] sm:$0xf] }
   0xa   :  { %664 = vmatprep.subr.mxu1 %v805_v9  ;;  %752 = vmatprep.subr.mxu0 %v806_v45 }
   0xb   :  { %131 = vperm.xlu0 %778, %v30_v10   ;;  %665 = vmatpush3.msra.mxu1 %v805_v9 }
   0xc   :  { %152 = vperm.xlu1 %779, %v33_v11   ;;  %666 = vmatprep.subr.mxu1 %v805_v9 }
   0xd   :  { %667 = vmatpush3.msra.mxu1 %v805_v9  ;;  %758 = vmatprep.mubr.msk.f32.mxu0 %vm807_vm2, %v806_v45 }
   0xe   :  { %668 = vmatprep.subr.mxu1 %v805_v9 }
   0xf   :  { %669 = vmatpush3.msra.mxu1 %v805_v9 }
  0x10   :  { %649 = vmatmul.mubr.msk.bf16.gmra.mxu1 %vm54_vm1, %v887_v12  ;;  %670 = vmatprep.subr.mxu1 %v805_v9 }
  0x11   :  { %671 = vmatpush3.msra.mxu1 %v805_v9 }
  0x12   :  { %672 = vmatprep.subr.mxu1 %v805_v9 }
  0x13   :  { %673 = vmatpush3.msra.mxu1 %v805_v9 }
  0x14   :  { %674 = vmatprep.subr.mxu1 %v805_v9 }
  0x15   :  { %675 = vmatpush3.msra.mxu1 %v805_v9 }
  0x16   :  { %676 = vmatprep.subr.mxu1 %v805_v9 }
  0x17   :  { %677 = vmatpush3.msra.mxu1 %v805_v9 }
  0x18   :  { %678 = vmatprep.subr.mxu1 %v805_v9 }
  0x19   :  { %679 = vmatpush3.msra.mxu1 %v805_v9 }
  0x1a   :  { %680 = vmatprep.subr.mxu1 %v805_v9 }
  0x1b   :  { %681 = vmatpush3.msra.mxu1 %v805_v9 }
  0x1c   :  { %682 = vmatprep.subr.mxu1 %v805_v9 }
  0x1d   :  { %683 = vmatpush3.msra.mxu1 %v805_v9 }
  0x1e   :  { %684 = vmatprep.subr.mxu1 %v805_v9 }
  0x1f   :  { %685 = vmatpush3.msra.mxu1 %v805_v9 }
  0x20   :  { %686 = vmatprep.subr.mxu1 %v805_v9 }
  0x21   :  { %687 = vmatpush3.msra.mxu1 %v805_v9 }
  0x22   :  { %688 = vmatprep.subr.mxu1 %v805_v9 }
  0x23   :  { %689 = vmatpush3.msra.mxu1 %v805_v9 }
  0x24   :  { %690 = vmatprep.subr.mxu1 %v805_v9 }
  0x25   :  { %691 = vmatpush3.msra.mxu1 %v805_v9 }
  0x26   :  { %692 = vmatprep.subr.mxu1 %v805_v9 }
  0x27   :  { %693 = vmatpush3.msra.mxu1 %v805_v9 }
  0x28   :  { %761 = vmatprep.subr.mxu1 %v806_v45 }
  0x7e   :  { %v920_v13 = vpop.permute.xlu0 %121  ;;  %v922_v14 = vpop.permute.xlu1 %126 }
  0x82   :  { %v925_v17 = vpop.permute.xlu0 %142 }
  0x83   :  { %v929_v22 = vpop.permute.xlu1 %147 }
  0x86   :  { %v934_v28 = vpop.permute.xlu0 %131 }
  0x87   :  { %v939_v35 = vpop.permute.xlu1 %152 }
  0xc8   :  { %v102_v15 = vpop.f32.mrf.mxu1 }
  0xc9   :  { %v134_v16 = vmul.f32 %v920_v13, %v102_v15 }
  0xca   :  { %v104_v18 = vpop.f32.mrf.mxu1 }
  0xcb   :  { %v135_v19 = vmul.f32 %v920_v13, %v104_v18  ;;  %v155_v20 = vadd.f32 %v925_v17, %v134_v16 }
  0xcc   :  { %v106_v21 = vpop.f32.mrf.mxu1 }
  0xcd   :  { %v156_v23 = vadd.f32 %v925_v17, %v135_v19  ;;  %v136_v24 = vmul.f32 %v922_v14, %v106_v21  ;;  %v161_v29 = vmax.f32 %v155_v20, 0.0 }
  0xce   :  { %v108_v25 = vpop.f32.mrf.mxu1 }
  0xcf   :  { %v162_v26 = vmax.f32 %v156_v23, 0.0  ;;  %v137_v27 = vmul.f32 %v922_v14, %v108_v25  ;;  %v157_v30 = vadd.f32 %v929_v22, %v136_v24 }
  0xd0   :  { %v112_v31 = vpop.f32.mrf.mxu1 }
  0xd1   :  { %v158_v32 = vadd.f32 %v929_v22, %v137_v27  ;;  %v138_v33 = vmul.f32 %v934_v28, %v112_v31  ;;  %231 = vmatprep.mubr.f32.mxu1 %v162_v26  ;;  %v163_v38 = vmax.f32 %v157_v30, 0.0 }
  0xd2   :  { %v114_v34 = vpop.f32.mrf.mxu1  ;;  %232 = vmatmul.mubr.f32.vlgmr.msra.gmra.mxu1 %v161_v29  ;;  %v331_v29 = vlaneseq }
  0xd3   :  { %v164_v36 = vmax.f32 %v158_v32, 0.0  ;;  %v139_v37 = vmul.f32 %v934_v28, %v114_v34  ;;  %v159_v39 = vadd.f32 %v939_v35, %v138_v33 }
  0xd4   :  { %v116_v40 = vpop.f32.mrf.mxu1  ;;  %v332_v31 = vshrl.u32 %v331_v29, 7 }
  0xd5   :  { %v160_v41 = vadd.f32 %v939_v35, %v139_v37  ;;  %236 = vmatprep.mubr.f32.mxu1 %v164_v36  ;;  %v165_v44 = vmax.f32 %v159_v39, 0.0 }
  0xd6   :  { %v117_v42 = vpop.f32.mrf.mxu1  ;;  %237 = vmatmul.mubr.f32.gmra.mxu1 %v163_v38 }
  0xd7   :  { %v166_v43 = vmax.f32 %v160_v41, 0.0 }
  0xd9   :  { %241 = vmatprep.mubr.f32.mxu1 %v166_v43 }
  0xda   :  { %242 = vmatmul.mubr.f32.gmra.mxu1 %v165_v44 }
  0xdb   :  { %767 = vmatprep.mubr.msk.f32.mxu1 %vm807_vm2, %v806_v45 }
 0x192   :  { %v694_v46 = vpop.f32.mrf.mxu1 }
 0x194   :  { %v695_v47 = vpop.f32.mrf.mxu1 }
 0x195   :  { %v696_v56 = vadd.f32 %v695_v47, %v694_v46 }
 0x196   :  { %v697_v48 = vpop.f32.mrf.mxu1 }
 0x198   :  { %v698_v49 = vpop.f32.mrf.mxu1 }
 0x199   :  { %v699_v54 = vadd.f32 %v698_v49, %v697_v48 }
 0x19a   :  { %v700_v50 = vpop.f32.mrf.mxu1 }
 0x19c   :  { %v701_v51 = vpop.f32.mrf.mxu1 }
 0x19d   :  { %v702_v52 = vadd.f32 %v701_v51, %v700_v50 }
 0x19f   :  { %753 = vmatpush3.msra.mxu0 %v702_v52 }
 0x1a0   :  { %754 = vmatprep.subr.mxu0 %v806_v45 }
 0x1a1   :  { %755 = vmatpush3.msra.mxu0 %v699_v54 }
 0x1a2   :  { %756 = vmatprep.subr.mxu0 %v806_v45 }
 0x1a3   :  { %757 = vmatpush3.msra.mxu0 %v696_v56 }
 0x1a4   :  { %759 = vmatmul.mubr.msk.f32.vlgmr.msra.gmra.mxu0 %vm247_vm3, %v955_v57  ;;  %655 = vmatprep.subr.msk.bf16.mxu0 %vm61_vm0, %v366_v55 }
 0x1a5   :  { %388 = vmatpush1.bf16.msra.mxu0 %v368_v58  ;;  %405 = vmatprep.mubr.bf16.mxu0 %v804_v3 }
 0x1a6   :  { %707 = vmatprep.subr.mxu0 %v805_v9 }
 0x1a8   :  { %656 = vmatmul.mubr.msk.bf16.vlgmr.msra.gmra.mxu0 %vm54_vm1, %v861_v5 }
 0x1a9   :  { %415 = vmatprep.mubr.bf16.mxu0 %v804_v3  ;;  %708 = vmatpush3.msra.mxu0 %v805_v9 }
 0x1aa   :  { %709 = vmatprep.subr.mxu0 %v805_v9 }
 0x1ab   :  { %710 = vmatpush3.msra.mxu0 %v805_v9 }
 0x1ac   :  { %711 = vmatprep.subr.mxu0 %v805_v9 }
 0x1ad   :  { %712 = vmatpush3.msra.mxu0 %v805_v9 }
 0x1ae   :  { %713 = vmatprep.subr.mxu0 %v805_v9 }
 0x1af   :  { %714 = vmatpush3.msra.mxu0 %v805_v9 }
 0x1b0   :  { %657 = vmatmul.mubr.msk.bf16.gmra.mxu0 %vm54_vm1, %v887_v12  ;;  %715 = vmatprep.subr.mxu0 %v805_v9 }
 0x1b1   :  { %716 = vmatpush3.msra.mxu0 %v805_v9 }
 0x1b2   :  { %717 = vmatprep.subr.mxu0 %v805_v9 }
 0x1b3   :  { %718 = vmatpush3.msra.mxu0 %v805_v9 }
 0x1b4   :  { %719 = vmatprep.subr.mxu0 %v805_v9 }
 0x1b5   :  { %720 = vmatpush3.msra.mxu0 %v805_v9 }
 0x1b6   :  { %721 = vmatprep.subr.mxu0 %v805_v9 }
 0x1b7   :  { %722 = vmatpush3.msra.mxu0 %v805_v9 }
 0x1b8   :  { %723 = vmatprep.subr.mxu0 %v805_v9 }
 0x1b9   :  { %724 = vmatpush3.msra.mxu0 %v805_v9 }
 0x1ba   :  { %725 = vmatprep.subr.mxu0 %v805_v9 }
 0x1bb   :  { %726 = vmatpush3.msra.mxu0 %v805_v9 }
 0x1bc   :  { %727 = vmatprep.subr.mxu0 %v805_v9 }
 0x1bd   :  { %728 = vmatpush3.msra.mxu0 %v805_v9 }
 0x1be   :  { %729 = vmatprep.subr.mxu0 %v805_v9 }
 0x1bf   :  { %730 = vmatpush3.msra.mxu0 %v805_v9 }
 0x1c0   :  { %731 = vmatprep.subr.mxu0 %v805_v9 }
 0x1c1   :  { %732 = vmatpush3.msra.mxu0 %v805_v9 }
 0x1c2   :  { %733 = vmatprep.subr.mxu0 %v805_v9 }
 0x1c3   :  { %734 = vmatpush3.msra.mxu0 %v805_v9 }
 0x1c4   :  { %735 = vmatprep.subr.mxu0 %v805_v9 }
 0x1c5   :  { %736 = vmatpush3.msra.mxu0 %v805_v9 }
 0x1c6   :  { %737 = vmatprep.subr.mxu0 %v805_v9 }
 0x1c7   :  { %738 = vmatpush3.msra.mxu0 %v805_v9 }
 0x264   :  { %v317_v60 = vpop.f32.mrf.mxu0 }
 0x265   :  { %v318_v61 = vadd.f32 %v317_v60, %v1003_v59 }
 0x266   :  { %v760_v62 = vpop.f32.mrf.mxu0 }
 0x267   :  { %v321_v63 = vmax.f32 %v318_v61, 0.0 }
 0x268   :  { %v407_v0 = vpop.f32.mrf.mxu0 }
 0x269   :  { %v424_v1 = vmul.f32 %v407_v0, %v920_v13  ;;  %326 = vperm.xlu0 %778, %v321_v63  }
 0x26a   :  { %v409_v2 = vpop.f32.mrf.mxu0 }
 0x26b   :  { %v425_v3 = vmul.f32 %v409_v2, %v920_v13  ;;  %v430_v4 = vadd.f32 %v424_v1, %v925_v17 }
 0x26c   :  { %v411_v5 = vpop.f32.mrf.mxu0 }
 0x26d   :  { %v431_v6 = vadd.f32 %v425_v3, %v925_v17  ;;  %v426_v7 = vmul.f32 %v411_v5, %v922_v14  ;;  %v436_v11 = vmax.f32 %v430_v4, 0.0 }
 0x26e   :  { %v413_v8 = vpop.f32.mrf.mxu0 }
 0x26f   :  { %v437_v9 = vmax.f32 %v431_v6, 0.0  ;;  %v427_v10 = vmul.f32 %v413_v8, %v922_v14  ;;  %v432_v12 = vadd.f32 %v426_v7, %v929_v22 }
 0x270   :  { %v417_v15 = vpop.f32.mrf.mxu0 }
 0x271   :  { %v433_v16 = vadd.f32 %v427_v10, %v929_v22  ;;  %v428_v18 = vmul.f32 %v417_v15, %v934_v28  ;;  %506 = vmatprep.mubr.f32.mxu0 %v437_v9  ;;  %v438_v20 = vmax.f32 %v432_v12, 0.0  ;;  %v808_v22 = vmov 839922192  }
 0x272   :  { %v419_v13 = vpop.f32.mrf.mxu0  ;;  %507 = vmatmul.mubr.f32.vlgmr.msra.gmra.mxu0 %v436_v11  ;;  %v329_v27 = vunpack.c.l.s4 %v808_v22 }
 0x273   :  { %v439_v19 = vmax.f32 %v433_v16, 0.0  ;;  %v429_v17 = vmul.f32 %v419_v13, %v934_v28  ;;  %v434_v21 = vadd.f32 %v428_v18, %v939_v35  ;;  %v322_v28 = vld [vmem:[%s1029_s0] sm:$0xff]   ;;  %s809_s0 = smov [#allocation2]  }
 0x274   :  { %v421_v23 = vpop.f32.mrf.mxu0  ;;  %v330_v30 = vunpack.c.0.s8 %v329_v27  ;;  %v323_v33 = vunpack.c.l.bf16 %v322_v28  ;;  %v595_v53 = vunpack.c.h.bf16 %v322_v28  ;;  %s632_s18 = sshll.u32 %s809_s0, 4  ;;  %s633_s18 = int_to_ptr.vmem [resolvable:$true] %s632_s18 }
 0x275   :  { %v435_v14 = vadd.f32 %v429_v17, %v939_v35  ;;  %511 = vmatprep.mubr.f32.mxu0 %v439_v19  ;;  %v440_v26 = vmax.f32 %v434_v21, 0.0  ;;  %s782_s19 = scalar_lea.vmem %s633_s18, 128  ;;  %p787_p1 = scmp.lt.s32.totalorder %s633_s18, %s633_s18 }
 0x276   :  { %v422_v24 = vpop.f32.mrf.mxu0  ;;  %512 = vmatmul.mubr.f32.gmra.mxu0 %v438_v20  ;;  %v333_v32 = vsub.s32 %v330_v30, %v332_v31  ;;  %p783_p0 = scmp.ne.s32.totalorder %s633_s18, %s782_s19  ;;  %p788_p2 = scmp.lt.s32.totalorder %s782_s19, %s782_s19 }
 0x277   :  { %v441_v25 = vmax.f32 %v435_v14, 0.0 }
 0x278   :  { %p789_p3 = por %p788_p2, %p787_p1 }
 0x279   :  { %516 = vmatprep.mubr.f32.mxu0 %v441_v25 }
 0x27a   :  { %517 = vmatmul.mubr.f32.gmra.mxu0 %v440_v26  ;;  %p790_p4 = pnand %p789_p3, %p783_p0 }
 0x2e4   :  { %v327_v34 = vpop.permute.xlu0 %326 }
 0x2e5   :  { %v334_v35 = vrot.slane %v327_v34, %v333_v32 }
 0x2e7   :  { %v336_v36 = vadd.f32 %v334_v35, %v323_v33 }
 0x2e9   :  { %v338_v37 = vcombine.high %v336_v36, %v336_v36 }
 0x2eb   :  { %v651_v38 = vpack.c.bf16 %v338_v37, %v336_v36 }
 0x2ed   :  { %652 = vst.sshfl [vmem:[#allocation2] sm:$0x33 pattern:$0x76325410] %v651_v38 }
 0x332   :  { %v739_v39 = vpop.f32.mrf.mxu0 }
 0x334   :  { %v740_v40 = vpop.f32.mrf.mxu0 }
 0x335   :  { %v741_v48 = vadd.f32 %v740_v40, %v739_v39 }
 0x336   :  { %v742_v41 = vpop.f32.mrf.mxu0 }
 0x338   :  { %v743_v42 = vpop.f32.mrf.mxu0 }
 0x339   :  { %v744_v47 = vadd.f32 %v743_v42, %v742_v41 }
 0x33a   :  { %v745_v43 = vpop.f32.mrf.mxu0 }
 0x33c   :  { %v746_v44 = vpop.f32.mrf.mxu0 }
 0x33d   :  { %v747_v46 = vadd.f32 %v746_v44, %v745_v43 }
 0x33f   :  { %762 = vmatpush3.msra.mxu1 %v747_v46 }
 0x340   :  { %763 = vmatprep.subr.mxu1 %v806_v45 }
 0x341   :  { %764 = vmatpush3.msra.mxu1 %v744_v47 }
 0x342   :  { %765 = vmatprep.subr.mxu1 %v806_v45 }
 0x343   :  { %766 = vmatpush3.msra.mxu1 %v741_v48 }
 0x344   :  { %768 = vmatmul.mubr.msk.f32.vlgmr.msra.gmra.mxu1 %vm247_vm3, %v955_v57 }
 0x404   :  { %v588_v49 = vpop.f32.mrf.mxu1 }
 0x405   :  { %v589_v50 = vadd.f32 %v588_v49, %v1003_v59 }
 0x406   :  { %v769_v51 = vpop.f32.mrf.mxu1 }
 0x407   :  { %v592_v52 = vmax.f32 %v589_v50, 0.0 }
 0x409   :  { %598 = vperm.xlu1 %779, %v592_v52  }
 0x484   :  { %v599_v54 = vpop.permute.xlu1 %598 }
 0x485   :  { %v606_v55 = vrot.slane %v599_v54, %v333_v32 }
 0x487   :  { %v608_v56 = vadd.f32 %v606_v55, %v595_v53 }
 0x489   :  { %v610_v58 = vcombine.high %v608_v56, %v608_v56 }
 0x48b   :  { %v660_v60 = vpack.c.bf16 %v610_v58, %v608_v56 }
 0x48d   :  { %661 = vst.sshfl [vmem:[#allocation2 + $0x4] sm:$0x33 pattern:$0x76325410] %v660_v60 }
 0x48e   :  { %793 = shalt.err (!%p790_p4)
}
 0x48f   :  { %s810_s20 = smov 64   ;;  %s811_s21 = smov 4  }
 0x490   :  { %638 = dma.vmem_to_hbm [thread:$0]  %s633_s18, 128, %s1035_s6, [#allocation3], %s810_s20, %s810_s20, %s811_s21  }
 0x491   :  { %802 = dma.done.wait [#allocation3], 128  }
 0x492   :  { %803 = vsyncadd [#allocation3], 4294967168 }
 0x493   :  { %642 = vsyncpa [#allocation3], 1 }

</bundles_post_ra>
